<compile_context>
chip_gen: v7x
topology: tpu7x:2x2x1
jax: 0.10.0
libtpu: 0.0.40
codegen_flags: <defaults>
</compile_context>

<pallas_src>
import jax
import jax.numpy as jnp
from jax.experimental import pallas as pl
from jax.experimental.pallas import tpu as pltpu


_GATHER_BLOCK_ROWS = 256   # output-row tile (matches 256-wide MXU on v6e/v7x)
_GATHER_K_ROWS = 512       # table-row (K) tile: bounds VMEM independent of max_len


def _round_up(x, m):
    return ((x + m - 1) // m) * m


# ----------------------------------------------------------------------------
# Contiguous branch: out = table[start : start + seq]
# ----------------------------------------------------------------------------
def _contig_copy_kernel(start_ref, table_ref, out_ref, sem):
    """One HBM->HBM DMA of the contiguous row range [start, start + seq)."""
    seq = out_ref.shape[0]
    cp = pltpu.make_async_copy(
        table_ref.at[pl.ds(start_ref[0], seq), :],   # HBM source, dynamic start
        out_ref,                                     # HBM destination (pl.ANY)
        sem,
    )
    cp.start()
    cp.wait()


def _embedding_contiguous(table, seq, start_time):
    """Lookup of a contiguous row range; also serves int / single-id inputs.

    NOTE: like the PyTorch module, assumes start_time + seq <= max_len; an
    out-of-range request trips the runtime DMA bounds check.
    """
    max_len, dim = table.shape
    start = jnp.asarray(start_time, dtype=jnp.int32).reshape(1)
    itemsize = jnp.dtype(table.dtype).itemsize

    return pl.pallas_call(
        _contig_copy_kernel,
        out_shape=jax.ShapeDtypeStruct((seq, dim), table.dtype),
        grid_spec=pltpu.PrefetchScalarGridSpec(
            num_scalar_prefetch=1,
            grid=(1,),
            in_specs=[pl.BlockSpec(memory_space=pl.ANY)],   # table stays in HBM
            out_specs=pl.BlockSpec(memory_space=pl.ANY),    # write straight to HBM
            scratch_shapes=[pltpu.SemaphoreType.DMA],
        ),
        cost_estimate=pl.CostEstimate(
            flops=0,
            transcendentals=0,
            bytes_accessed=2 * seq * dim * itemsize,
        ),
    )(start, table)


# ----------------------------------------------------------------------------
# General gather branch: out[j] = table[ids[j]]   (1-D index tensors, n > 1)
# ----------------------------------------------------------------------------
def _onehot_gather_kernel(ids_ref, hi_ref, mid_ref, lo_ref, out_ref, acc_ref):
    """Row gather via one-hot MXU matmul over K-tiles of the pre-split table."""
    k = pl.program_id(1)
    tk = hi_ref.shape[0]

    @pl.when(k == 0)
    def _():
        acc_ref[...] = jnp.zeros_like(acc_ref)

    ids = ids_ref[...]                                        # (tile, 1) int32
    tile = ids.shape[0]
    iota = jax.lax.broadcasted_iota(jnp.int32, (tile, tk), 1) + k * tk
    one = jnp.ones((), dtype=jnp.bfloat16)
    zero = jnp.zeros((), dtype=jnp.bfloat16)
    onehot = jnp.where(ids == iota, one, zero)                # exact 0/1 in bf16

    acc = acc_ref[...]
    acc = acc + jnp.dot(onehot, hi_ref[...], preferred_element_type=jnp.float32)
    acc = acc + jnp.dot(onehot, mid_ref[...], preferred_element_type=jnp.float32)
    acc = acc + jnp.dot(onehot, lo_ref[...], preferred_element_type=jnp.float32)
    acc_ref[...] = acc

    @pl.when(k == pl.num_programs(1) - 1)
    def _():
        out_ref[...] = acc_ref[...].astype(out_ref.dtype)


def _embedding_gather(table, ids):
    """General 1-D index lookup: out[j] = table[ids[j]].

    NOTE: ids outside [0, max_len) produce an all-zero output row (the one-hot
    never matches) rather than raising like torch.nn.Embedding.
    """
    max_len, dim = table.shape
    n = int(ids.shape[0])
    tile = min(_GATHER_BLOCK_ROWS, _round_up(n, 8))
    nsteps = -(-n // tile)
    n_pad = nsteps * tile

    tk = min(_GATHER_K_ROWS, _round_up(max_len, 8))
    ksteps = -(-max_len // tk)
    k_pad = ksteps * tk

    # Exact 3-term bf16 split of the f32 table, computed ONCE in the wrapper
    # (not per grid step).  Zero-pad rows to a whole K-tile so the last K
    # block never multiplies garbage (padded rows: one-hot 0 * table 0).
    t = table.astype(jnp.float32)
    hi = t.astype(jnp.bfloat16)
    r1 = t - hi.astype(jnp.float32)
    mid = r1.astype(jnp.bfloat16)
    lo = (r1 - mid.astype(jnp.float32)).astype(jnp.bfloat16)
    if k_pad != max_len:
        pad = ((0, k_pad - max_len), (0, 0))
        hi = jnp.pad(hi, pad)
        mid = jnp.pad(mid, pad)
        lo = jnp.pad(lo, pad)

    # Pad ids to a whole tile with 0 (a valid row) so the last ids block never
    # reads undefined memory; the extra output rows are clipped on writeback.
    ids2d = ids.astype(jnp.int32).reshape(n, 1)
    if n_pad != n:
        ids2d = jnp.pad(ids2d, ((0, n_pad - n), (0, 0)))

    itemsize = jnp.dtype(table.dtype).itemsize
    # VMEM budget: double-buffered ids / hi / mid / lo / out blocks + the f32
    # accumulator + one-hot & iota intermediates, with 2x headroom (capped at
    # v7x's 64 MiB physical VMEM).
    vmem_bytes = (
        2 * tile * 4                      # ids blocks
        + 2 * 3 * tk * dim * 2            # hi / mid / lo blocks (bf16)
        + 2 * tile * dim * 4              # output blocks (f32)
        + tile * dim * 4                  # accumulator scratch
        + tile * tk * (2 + 4)             # one-hot (bf16) + iota (int32)
    )
    vmem_limit = int(min(max(2 * vmem_bytes, 32 * 1024 * 1024), 64 * 1024 * 1024))

    return pl.pallas_call(
        _onehot_gather_kernel,
        out_shape=jax.ShapeDtypeStruct((n, dim), table.dtype),
        grid_spec=pltpu.PrefetchScalarGridSpec(
            num_scalar_prefetch=0,
            grid=(nsteps, ksteps),                    # K (reduction) axis last
            in_specs=[
                pl.BlockSpec((tile, 1), lambda i, k: (i, 0)),
                pl.BlockSpec((tk, dim), lambda i, k: (k, 0)),
                pl.BlockSpec((tk, dim), lambda i, k: (k, 0)),
                pl.BlockSpec((tk, dim), lambda i, k: (k, 0)),
            ],
            out_specs=pl.BlockSpec((tile, dim), lambda i, k: (i, 0)),
            scratch_shapes=[pltpu.VMEM((tile, dim), jnp.float32)],
        ),
        compiler_params=pltpu.CompilerParams(
            dimension_semantics=("parallel", "arbitrary"),
            vmem_limit_bytes=vmem_limit,
        ),
        cost_estimate=pl.CostEstimate(
            flops=2 * 3 * n_pad * k_pad * dim,
            transcendentals=0,
            bytes_accessed=3 * k_pad * dim * 2 + n * dim * itemsize + n_pad * 4,
        ),
    )(ids2d, hi, mid, lo)


# ----------------------------------------------------------------------------
# Module forward
# ----------------------------------------------------------------------------
def nn_embedding_encoding(table, x, start_time=0):
    """Forward pass of NNEmbeddingEncoding.

    table: (max_len, dim) embedding weights.
    x:     int, 1-D int array, or >=2-D array (only x.shape[1] is used).
    """
    if isinstance(x, int):
        # Single-row lookup: one dim-sized DMA instead of a full-table gather.
        return _embedding_contiguous(table, 1, x)
    x = jnp.asarray(x)
    if x.ndim == 1:
        ids = x.astype(jnp.int32)
        if int(ids.shape[0]) == 1:
            return _embedding_contiguous(table, 1, ids[0])
        return _embedding_gather(table, ids)
    # >=2-D: contiguous positions arange(x.shape[1]) + start_time -> pure copy.
    return _embedding_contiguous(table, int(x.shape[1]), start_time)


if __name__ == "__main__":
    key = jax.random.PRNGKey(0)
    max_len, dim = 64, 128
    batch, seq = 2, 8

    k_table, k_x, k_ids, k_tbl2, k_ids2 = jax.random.split(key, 5)
    table = jax.random.normal(k_table, (max_len, dim), dtype=jnp.float32)

    # --- branch 3: x is >=2-D -> arange(x.shape[1]) + start_time (contiguous) ---
    x = jax.random.normal(k_x, (batch, seq, dim), dtype=jnp.float32)
    start_time = 3
    out = jax.block_until_ready(nn_embedding_encoding(table, x, start_time=start_time))
    ref = table[jnp.arange(seq) + start_time]
    assert out.shape == (seq, dim)
    assert jnp.array_equal(out, ref), "2-D (contiguous) branch mismatch"

    # --- branch 2: x is a 1-D index tensor (general gather) ---
    ids_1d = jax.random.randint(k_ids, (5,), 0, max_len, dtype=jnp.int32)
    out1d = jax.block_until_ready(nn_embedding_encoding(table, ids_1d))
    assert out1d.shape == (5, dim)
    assert jnp.allclose(out1d, table[ids_1d], rtol=1e-6, atol=1e-6), "1-D branch mismatch"

    # --- branch 2b: 1-D gather on a table large enough to exercise K-tiling ---
    max_len2 = 600
    table2 = jax.random.normal(k_tbl2, (max_len2, dim), dtype=jnp.float32)
    ids_1d2 = jax.random.randint(k_ids2, (17,), 0, max_len2, dtype=jnp.int32)
    out1d2 = jax.block_until_ready(nn_embedding_encoding(table2, ids_1d2))
    assert out1d2.shape == (17, dim)
    assert jnp.allclose(out1d2, table2[ids_1d2], rtol=1e-6, atol=1e-6), \
        "K-tiled gather branch mismatch"

    # --- branch 1: x is a plain int (routed through the single-row DMA path) ---
    outi = jax.block_until_ready(nn_embedding_encoding(table, 7))
    assert outi.shape == (1, dim)
    assert jnp.array_equal(outi, table[7:8]), "int branch mismatch"

    print("KERNEL_OK")
</pallas_src>

<mosaic_0001>
module attributes {stable_mosaic.version = 11 : i64} {
  func.func @_contig_copy_kernel(%arg0: i32, %arg1: memref<1xi32, #tpu.memory_space<smem>>, %arg2: memref<64x128xf32, #tpu.memory_space<any>>, %arg3: memref<8x128xf32, #tpu.memory_space<any>>, %arg4: memref<!tpu.dma_semaphore, #tpu.memory_space<semaphore_mem>>) attributes {dimension_semantics = [#tpu.dimension_semantics<arbitrary>], iteration_bounds = array<i64: 1>, scalar_prefetch = 1 : i64, scratch_operands = 1 : i64, tpu.core_type = #tpu.core_type<tc>, window_params = [{}, {}]} {
    %c0 = arith.constant 0 : index
    %0 = memref.load %arg1[%c0] : memref<1xi32, #tpu.memory_space<smem>>
    %c0_i32 = arith.constant 0 : i32
    %1 = tpu.memref_slice %arg2[%0, %c0_i32] : memref<64x128xf32, #tpu.memory_space<any>> -> memref<8x128xf32, #tpu.memory_space<any>>
    tpu.enqueue_dma source(%1 : memref<8x128xf32, #tpu.memory_space<any>>) target(%arg3 : memref<8x128xf32, #tpu.memory_space<any>>) target_semaphore(%arg4 : memref<!tpu.dma_semaphore, #tpu.memory_space<semaphore_mem>>)
    %c0_i32_0 = arith.constant 0 : i32
    %2 = tpu.memref_slice %arg2[%0, %c0_i32_0] : memref<64x128xf32, #tpu.memory_space<any>> -> memref<8x128xf32, #tpu.memory_space<any>>
    tpu.wait_dma2 semaphore(%arg4 : memref<!tpu.dma_semaphore, #tpu.memory_space<semaphore_mem>>) src(%2 : memref<8x128xf32, #tpu.memory_space<any>>) dst(%arg3 : memref<8x128xf32, #tpu.memory_space<any>>)
    return
  }
}

</mosaic_0001>

<bundles_post_ra>
// kernel: tpu_custom_call.1
= control target key start
LH: loop header
LB: loop body
LE: loop exit
PB: predicated region body
PF: predicated region fallthrough
CT: control target
= control target key end

     0   :  { %s42_s15 = smov [#allocation2]   ;;  %s43_s16 = smov [#allocation5]   ;;  %s69_s0 = inlined_call_operand.<no memory space> [shape: s32[1], index: 0, kind: input, shape index: {}]   ;;  %s70_s1 = inlined_call_operand.hbm [shape: f32[64,128], index: 1, kind: input, shape index: {}]   ;;  %s71_s2 = inlined_call_operand.hbm [shape: f32[8,128], index: 2, kind: output, shape index: {}]  }
   0x1   :  { %s35_s11 = sshll.u32 %s69_s0, 4  ;;  %s44_s17 = smov 0  }
   0x2   :  { %s10_s14 = scalar_lea.hbm %s70_s1, %s35_s11 }
   0x3   :  { %23 = dma.general %s10_s14, 128, %s71_s2, %s42_s15, %s43_s16, [#allocation6], %s44_s17, 0  }
   0x4   :  { %40 = dma.done.wait [#allocation2], 128 }
   0x5   :  { %41 = vsyncadd [#allocation2], 4294967168 }
   0x6   :  { %27 = vsyncmov [#allocation2] }
   0x9   :  { %s28_s20 = vpop.sfrf %27 }
   0xa   :  { %p36_p0 = scmp.ne.s32.totalorder %s28_s20, 0 }
   0xc   :  { %32 = shalt.err (%p36_p0)  }

</bundles_post_ra>
